<compile_context>
chip_gen: v7x
topology: tpu7x:2x2x1
jax: 0.10.0
libtpu: 0.0.40
codegen_flags: <defaults>
</compile_context>

<pallas_src>
import functools

import jax
import jax.numpy as jnp
from jax.experimental import pallas as pl
from jax.experimental.pallas import tpu as pltpu


NEG_SLOPE = 0.2
OUT_ROWS = 8                           # sublane-padded rows of the transposed fc_end output
VMEM_LIMIT_BYTES = 48 * 1024 * 1024    # explicit scoped-VMEM limit (fits v7x's 64 MiB physical)
VMEM_BUDGET_BYTES = 36 * 1024 * 1024   # target for the auto batch-tile; leaves compiler headroom


def _round_up(x, m):
    return (x + m - 1) // m * m


def disc_mlp_kernel(compute_dtype, x_ref, *refs):
    """refs = (w_1, [w_2], [w_3], w_end, hidden_biases, end_bias, out).

    Hidden weights are pre-transposed to [in, out]; fc_end stays [out, in] and
    is applied transposed so the kernel writes an (OUT_ROWS, tb) lane-dense
    block instead of a (tb, 128) slab with a single meaningful lane.
    Matmul operands are cast to `compute_dtype`; accumulation is f32.
    """
    *w_refs, wend_ref, b_ref, bend_ref, o_ref = refs

    x = x_ref[...]                                          # (tb, d_in)
    for l, w_ref in enumerate(w_refs):
        h = jnp.dot(x.astype(compute_dtype), w_ref[...],    # (tb, H_pad), f32 acc
                    preferred_element_type=jnp.float32)
        h = h + b_ref[l:l + 1, :]                           # sublane-broadcast bias (f32)
        x = jnp.maximum(h, NEG_SLOPE * h)                   # leaky ReLU: mul+max (2 VALU ops)

    # fc_end, transposed: (OUT_ROWS, H_pad) x (tb, H_pad), contracting dim 1 of
    # both -> (OUT_ROWS, tb).  Only row 0 carries the real logit.
    logits = jax.lax.dot_general(
        wend_ref[...], x.astype(compute_dtype),
        dimension_numbers=(((1,), (1,)), ((), ())),
        preferred_element_type=jnp.float32)
    o_ref[...] = (logits + bend_ref[...]).astype(o_ref.dtype)


def prepare_params(params, num_hidden_layers, compute_dtype=jnp.bfloat16,
                   lane_multiple=128):
    """One-time prep (not per forward call):
      * hidden dim zero-padded to `lane_multiple` lanes (128 default; use 256 on
        v6e/v7x when hidden_size > 128 to fill the 256-wide MXUs),
      * hidden weights transposed to [in, out] so the MXU gets a canonical RHS,
      * fc_end kept [out, in] but padded to OUT_ROWS rows (transposed output),
      * weights cast to the MXU compute dtype,
      * hidden biases stacked into a single (L, H_pad) f32 buffer,
        end bias stored as an (OUT_ROWS, 1) f32 column.
    Zero padding keeps the math exact (padded lanes stay exactly zero)."""
    w1, b1, w2, b2, w3, b3, wend, bend = params
    H = w1.shape[0]
    H_pad = _round_up(H, max(lane_multiple, 128))

    def pad2(a, rows, cols):
        return jnp.pad(a, ((0, rows - a.shape[0]), (0, cols - a.shape[1])))

    def pad_b(b):
        return jnp.pad(b, (0, H_pad - b.shape[0]))

    ws = [pad2(w1.T, w1.shape[1], H_pad).astype(compute_dtype)]       # (d_in, H_pad)
    bs = [pad_b(b1)]
    if num_hidden_layers > 1:
        ws.append(pad2(w2.T, H_pad, H_pad).astype(compute_dtype))     # (H_pad, H_pad)
        bs.append(pad_b(b2))
    if num_hidden_layers > 2:
        ws.append(pad2(w3.T, H_pad, H_pad).astype(compute_dtype))
        bs.append(pad_b(b3))
    wend_pad = pad2(wend, OUT_ROWS, H_pad).astype(compute_dtype)      # (OUT_ROWS, H_pad), [out, in]
    biases = jnp.stack(bs, axis=0).astype(jnp.float32)                # (L, H_pad)
    bend_col = jnp.pad(bend, (0, OUT_ROWS - bend.shape[0]))
    bend_col = bend_col.reshape(OUT_ROWS, 1).astype(jnp.float32)      # (OUT_ROWS, 1)
    return tuple(ws) + (wend_pad, biases, bend_col)


def _estimate_vmem_bytes(tb, d_in, h_pad, feat_itemsize, const_bytes):
    feat = 2 * tb * d_in * feat_itemsize        # double-buffered feature tiles
    out = 2 * OUT_ROWS * tb * 4                 # double-buffered output tiles
    act = 3 * tb * h_pad * 4                    # live f32 activations + cast copy
    return feat + out + act + const_bytes       # constants are single-buffered


def _pick_batch_tile(B, d_in, h_pad, feat_itemsize, const_bytes,
                     budget=VMEM_BUDGET_BYTES):
    # Largest tile first (per-grid-step overhead ~0.35 us; bigger tiles push the
    # kernel toward the HBM roofline), bounded by the VMEM budget.  Candidates
    # are multiples of 128 so the (OUT_ROWS, tb) output block stays lane-dense
    # (unmasked vst); tb == B is always legal (full-extent block).
    cands = [c for c in (2048, 1024, 512, 256, 128) if c <= B and B % c == 0]
    fitting = [c for c in cands
               if _estimate_vmem_bytes(c, d_in, h_pad, feat_itemsize,
                                       const_bytes) <= budget]
    multi = [c for c in fitting if B // c >= 2]   # keep >=2 grid steps (pipelining / v7x TCs)
    if multi:
        return multi[0]
    if fitting:
        return fitting[0]
    return B


def disc_mlp_forward(features, prepared, compute_dtype=jnp.bfloat16, tb=None):
    """features: [B, input_size * num_members] (f32 or bf16) -> logits [B, 1] f32."""
    *ws, wend_pad, biases, bend_col = prepared
    B, d_in = features.shape
    h_pad = biases.shape[-1]
    const_arrays = tuple(ws) + (wend_pad, biases, bend_col)
    const_bytes = sum(int(a.size) * a.dtype.itemsize for a in const_arrays)

    if tb is None:
        tb = _pick_batch_tile(B, d_in, h_pad, features.dtype.itemsize, const_bytes)
    assert B % tb == 0, "batch must be divisible by the batch tile"
    assert tb % 128 == 0 or tb == B, \
        "tb must be a multiple of 128 (lane-dense output store) or the full batch"
    grid = (B // tb,)

    buffered = getattr(pl, "Buffered", None)

    def const_spec(a):
        idx = lambda i: (0,) * a.ndim
        if buffered is not None:
            try:
                # Constant-index operand: single VMEM buffer (no double-buffering).
                return pl.BlockSpec(a.shape, idx, pipeline_mode=buffered(1))
            except TypeError:
                pass
        return pl.BlockSpec(a.shape, idx)

    in_specs = ([pl.BlockSpec((tb, d_in), lambda i: (i, 0))]
                + [const_spec(a) for a in const_arrays])
    out_specs = pl.BlockSpec((OUT_ROWS, tb), lambda i: (0, i))

    kernel = functools.partial(disc_mlp_kernel, compute_dtype)
    out_slab = pl.pallas_call(
        kernel,
        out_shape=jax.ShapeDtypeStruct((OUT_ROWS, B), jnp.float32),
        grid=grid,
        in_specs=in_specs,
        out_specs=out_specs,
        compiler_params=pltpu.CompilerParams(
            # Batch tiles are independent.  On v7x, pltpu.CORE_PARALLEL can be
            # substituted here to force the grid across both TensorCores; the
            # tb heuristic already keeps the grid length >= 2 when it can.
            dimension_semantics=("parallel",),
            vmem_limit_bytes=VMEM_LIMIT_BYTES),
    )(features, *const_arrays)

    # Row 0 of the (OUT_ROWS, B) slab carries the real logit for each sample.
    return out_slab[0].reshape(-1, 1)


def kaiming_normal(key, out_features, in_features):
    # torch.nn.init.kaiming_normal_ default: fan_in mode, a=0 -> std = sqrt(2/fan_in)
    std = jnp.sqrt(2.0 / in_features)
    return std * jax.random.normal(key, (out_features, in_features), jnp.float32)


def make_params(key, input_size, num_members, hidden_size, num_hidden_layers):
    d_in = input_size * num_members
    k1, k2, k3, k4 = jax.random.split(key, 4)
    w1 = kaiming_normal(k1, hidden_size, d_in)
    b1 = jnp.zeros((hidden_size,), jnp.float32)
    if num_hidden_layers > 1:
        w2 = kaiming_normal(k2, hidden_size, hidden_size)
    else:
        w2 = jnp.zeros((hidden_size, hidden_size), jnp.float32)
    b2 = jnp.zeros((hidden_size,), jnp.float32)
    if num_hidden_layers > 2:
        w3 = kaiming_normal(k3, hidden_size, hidden_size)
    else:
        w3 = jnp.zeros((hidden_size, hidden_size), jnp.float32)
    b3 = jnp.zeros((hidden_size,), jnp.float32)
    wend = kaiming_normal(k4, 1, hidden_size)
    bend = jnp.zeros((1,), jnp.float32)
    return (w1, b1, w2, b2, w3, b3, wend, bend)


def reference_forward(features, params, num_hidden_layers):
    w1, b1, w2, b2, w3, b3, wend, bend = params
    x = features @ w1.T + b1
    x = jnp.where(x > 0, x, NEG_SLOPE * x)
    if num_hidden_layers > 1:
        x = x @ w2.T + b2
        x = jnp.where(x > 0, x, NEG_SLOPE * x)
    if num_hidden_layers > 2:
        x = x @ w3.T + b3
        x = jnp.where(x > 0, x, NEG_SLOPE * x)
    logits = x @ wend.T + bend
    return logits.reshape(-1, 1)


if __name__ == "__main__":
    # Small shapes consistent with the module's hparams.
    batch = 256
    input_size = 16
    num_members = 2
    hidden_size = 32
    num_hidden_layers = 3

    key = jax.random.PRNGKey(0)
    k_feat, k_param = jax.random.split(key)

    features = jax.random.normal(
        k_feat, (batch, input_size * num_members), jnp.float32)
    params = make_params(k_param, input_size, num_members,
                         hidden_size, num_hidden_layers)
    ref = reference_forward(features, params, num_hidden_layers)

    # f32 compute path: must match the f32 reference tightly.
    prep_f32 = prepare_params(params, num_hidden_layers, jnp.float32)
    out_f32 = jax.block_until_ready(disc_mlp_forward(features, prep_f32, jnp.float32))
    assert out_f32.shape == (batch, 1)
    assert jnp.allclose(out_f32, ref, atol=1e-5, rtol=1e-5)

    # bf16-operand / f32-accumulate path (MXU peak on v6e/v7x): loose tolerance.
    prep_bf16 = prepare_params(params, num_hidden_layers, jnp.bfloat16)
    out_bf16 = jax.block_until_ready(disc_mlp_forward(features, prep_bf16, jnp.bfloat16))
    assert out_bf16.shape == (batch, 1)
    assert jnp.allclose(out_bf16, ref, atol=1e-1, rtol=5e-2)

    # Single-hidden-layer variant (exercises the variable operand count).
    ref1 = reference_forward(features, params, 1)
    prep1 = prepare_params(params, 1, jnp.float32)
    out1 = jax.block_until_ready(disc_mlp_forward(features, prep1, jnp.float32))
    assert out1.shape == (batch, 1)
    assert jnp.allclose(out1, ref1, atol=1e-5, rtol=1e-5)

    print("KERNEL_OK")
</pallas_src>

<mosaic_0001>
module attributes {stable_mosaic.version = 11 : i64} {
  func.func @disc_mlp_kernel(%arg0: i32, %arg1: memref<128x32xf32, #tpu.memory_space<vmem>>, %arg2: memref<32x128xf32, #tpu.memory_space<vmem>>, %arg3: memref<128x128xf32, #tpu.memory_space<vmem>>, %arg4: memref<128x128xf32, #tpu.memory_space<vmem>>, %arg5: memref<8x128xf32, #tpu.memory_space<vmem>>, %arg6: memref<3x128xf32, #tpu.memory_space<vmem>>, %arg7: memref<8x1xf32, #tpu.memory_space<vmem>>, %arg8: memref<8x128xf32, #tpu.memory_space<vmem>>) attributes {dimension_semantics = [#tpu.dimension_semantics<parallel>], iteration_bounds = array<i64: 2>, scalar_prefetch = 0 : i64, scratch_operands = 0 : i64, tpu.core_type = #tpu.core_type<tc>, window_params = [{transform_indices = @transform_0, window_bounds = array<i64: 128, 32>}, {pipeline_mode = #tpu.pipeline_mode<synchronous>, transform_indices = @transform_1, window_bounds = array<i64: 32, 128>}, {pipeline_mode = #tpu.pipeline_mode<synchronous>, transform_indices = @transform_2, window_bounds = array<i64: 128, 128>}, {pipeline_mode = #tpu.pipeline_mode<synchronous>, transform_indices = @transform_3, window_bounds = array<i64: 128, 128>}, {pipeline_mode = #tpu.pipeline_mode<synchronous>, transform_indices = @transform_4, window_bounds = array<i64: 8, 128>}, {pipeline_mode = #tpu.pipeline_mode<synchronous>, transform_indices = @transform_5, window_bounds = array<i64: 3, 128>}, {pipeline_mode = #tpu.pipeline_mode<synchronous>, transform_indices = @transform_6, window_bounds = array<i64: 8, 1>}, {transform_indices = @transform_7, window_bounds = array<i64: 8, 128>}]} {
    %c0 = arith.constant 0 : index
    %c0_0 = arith.constant 0 : index
    %0 = vector.load %arg1[%c0, %c0_0] : memref<128x32xf32, #tpu.memory_space<vmem>>, vector<128x32xf32>
    %c0_1 = arith.constant 0 : index
    %c0_2 = arith.constant 0 : index
    %1 = vector.load %arg2[%c0_1, %c0_2] : memref<32x128xf32, #tpu.memory_space<vmem>>, vector<32x128xf32>
    %cst = arith.constant dense<0.000000e+00> : vector<128x128xf32>
    %2 = tpu.matmul %0, %1, %cst {dimension_numbers = #tpu.dot_dimension_numbers<[1], [0], [0], [1], [0, 0, 1, 1], [], []>} : vector<128x32xf32>, vector<32x128xf32>, vector<128x128xf32> -> vector<128x128xf32>
    %c0_3 = arith.constant 0 : index
    %c0_4 = arith.constant 0 : index
    %3 = vector.load %arg6[%c0_3, %c0_4] : memref<3x128xf32, #tpu.memory_space<vmem>>, vector<1x128xf32>
    %4 = vector.broadcast %3 : vector<1x128xf32> to vector<128x128xf32>
    %5 = arith.addf %2, %4 : vector<128x128xf32>
    %cst_5 = arith.constant 2.000000e-01 : f32
    %6 = vector.broadcast %cst_5 : f32 to vector<128x128xf32>
    %7 = arith.mulf %6, %5 : vector<128x128xf32>
    %8 = arith.maximumf %5, %7 : vector<128x128xf32>
    %c0_6 = arith.constant 0 : index
    %c0_7 = arith.constant 0 : index
    %9 = vector.load %arg3[%c0_6, %c0_7] : memref<128x128xf32, #tpu.memory_space<vmem>>, vector<128x128xf32>
    %cst_8 = arith.constant dense<0.000000e+00> : vector<128x128xf32>
    %10 = tpu.matmul %8, %9, %cst_8 {dimension_numbers = #tpu.dot_dimension_numbers<[1], [0], [0], [1], [0, 0, 1, 1], [], []>} : vector<128x128xf32>, vector<128x128xf32>, vector<128x128xf32> -> vector<128x128xf32>
    %c1 = arith.constant 1 : index
    %c0_9 = arith.constant 0 : index
    %11 = vector.load %arg6[%c1, %c0_9] : memref<3x128xf32, #tpu.memory_space<vmem>>, vector<1x128xf32>
    %12 = vector.broadcast %11 : vector<1x128xf32> to vector<128x128xf32>
    %13 = arith.addf %10, %12 : vector<128x128xf32>
    %cst_10 = arith.constant 2.000000e-01 : f32
    %14 = vector.broadcast %cst_10 : f32 to vector<128x128xf32>
    %15 = arith.mulf %14, %13 : vector<128x128xf32>
    %16 = arith.maximumf %13, %15 : vector<128x128xf32>
    %c0_11 = arith.constant 0 : index
    %c0_12 = arith.constant 0 : index
    %17 = vector.load %arg4[%c0_11, %c0_12] : memref<128x128xf32, #tpu.memory_space<vmem>>, vector<128x128xf32>
    %cst_13 = arith.constant dense<0.000000e+00> : vector<128x128xf32>
    %18 = tpu.matmul %16, %17, %cst_13 {dimension_numbers = #tpu.dot_dimension_numbers<[1], [0], [0], [1], [0, 0, 1, 1], [], []>} : vector<128x128xf32>, vector<128x128xf32>, vector<128x128xf32> -> vector<128x128xf32>
    %c2 = arith.constant 2 : index
    %c0_14 = arith.constant 0 : index
    %19 = vector.load %arg6[%c2, %c0_14] : memref<3x128xf32, #tpu.memory_space<vmem>>, vector<1x128xf32>
    %20 = vector.broadcast %19 : vector<1x128xf32> to vector<128x128xf32>
    %21 = arith.addf %18, %20 : vector<128x128xf32>
    %cst_15 = arith.constant 2.000000e-01 : f32
    %22 = vector.broadcast %cst_15 : f32 to vector<128x128xf32>
    %23 = arith.mulf %22, %21 : vector<128x128xf32>
    %24 = arith.maximumf %21, %23 : vector<128x128xf32>
    %c0_16 = arith.constant 0 : index
    %c0_17 = arith.constant 0 : index
    %25 = vector.load %arg5[%c0_16, %c0_17] : memref<8x128xf32, #tpu.memory_space<vmem>>, vector<8x128xf32>
    %cst_18 = arith.constant dense<0.000000e+00> : vector<8x128xf32>
    %26 = tpu.matmul %25, %24, %cst_18 {dimension_numbers = #tpu.dot_dimension_numbers<[1], [1], [0], [0], [0, 0, 1, 0], [], []>} : vector<8x128xf32>, vector<128x128xf32>, vector<8x128xf32> -> vector<8x128xf32>
    %c0_19 = arith.constant 0 : index
    %c0_20 = arith.constant 0 : index
    %27 = vector.load %arg7[%c0_19, %c0_20] : memref<8x1xf32, #tpu.memory_space<vmem>>, vector<8x1xf32>
    %28 = vector.broadcast %27 : vector<8x1xf32> to vector<8x128xf32>
    %29 = arith.addf %26, %28 : vector<8x128xf32>
    %c0_21 = arith.constant 0 : index
    %c0_22 = arith.constant 0 : index
    %30 = vector.load %arg8[%c0_21, %c0_22] : memref<8x128xf32, #tpu.memory_space<vmem>>, vector<8x128xf32>
    tpu.vector_store %arg8[%c0_21, %c0_22], %29 {strides = array<i32>} : memref<8x128xf32, #tpu.memory_space<vmem>>, vector<8x128xf32>,
    return
  }
  func.func @transform_0(%arg0: i32) -> (i32, i32) {
    %c0_i32 = arith.constant 0 : i32
    %c0_i32_0 = arith.constant 0 : i32
    return %arg0, %c0_i32 : i32, i32
  }
  func.func @transform_1(%arg0: i32) -> (i32, i32) {
    %c0_i32 = arith.constant 0 : i32
    %c0_i32_0 = arith.constant 0 : i32
    %c0_i32_1 = arith.constant 0 : i32
    return %c0_i32, %c0_i32_0 : i32, i32
  }
  func.func @transform_2(%arg0: i32) -> (i32, i32) {
    %c0_i32 = arith.constant 0 : i32
    %c0_i32_0 = arith.constant 0 : i32
    %c0_i32_1 = arith.constant 0 : i32
    return %c0_i32, %c0_i32_0 : i32, i32
  }
  func.func @transform_3(%arg0: i32) -> (i32, i32) {
    %c0_i32 = arith.constant 0 : i32
    %c0_i32_0 = arith.constant 0 : i32
    %c0_i32_1 = arith.constant 0 : i32
    return %c0_i32, %c0_i32_0 : i32, i32
  }
  func.func @transform_4(%arg0: i32) -> (i32, i32) {
    %c0_i32 = arith.constant 0 : i32
    %c0_i32_0 = arith.constant 0 : i32
    %c0_i32_1 = arith.constant 0 : i32
    return %c0_i32, %c0_i32_0 : i32, i32
  }
  func.func @transform_5(%arg0: i32) -> (i32, i32) {
    %c0_i32 = arith.constant 0 : i32
    %c0_i32_0 = arith.constant 0 : i32
    %c0_i32_1 = arith.constant 0 : i32
    return %c0_i32, %c0_i32_0 : i32, i32
  }
  func.func @transform_6(%arg0: i32) -> (i32, i32) {
    %c0_i32 = arith.constant 0 : i32
    %c0_i32_0 = arith.constant 0 : i32
    %c0_i32_1 = arith.constant 0 : i32
    return %c0_i32, %c0_i32_0 : i32, i32
  }
  func.func @transform_7(%arg0: i32) -> (i32, i32) {
    %c0_i32 = arith.constant 0 : i32
    %c0_i32_0 = arith.constant 0 : i32
    return %c0_i32, %arg0 : i32, i32
  }
}

</mosaic_0001>

<bundles_post_ra>
// kernel: tpu_custom_call.1
= control target key start
LH: loop header
LB: loop body
LE: loop exit
PB: predicated region body
PF: predicated region fallthrough
CT: control target
= control target key end

     0   :  { %12 = vsyncpa [#allocation3], 0  ;;  %s1954_s0 = inlined_call_operand.vmem [shape: f32[256,32], index: 0, kind: input, shape index: {}]   ;;  %s1955_s1 = inlined_call_operand.vmem [shape: f32[32,128], index: 1, kind: input, shape index: {}]   ;;  %s1956_s2 = inlined_call_operand.vmem [shape: f32[128,128], index: 2, kind: input, shape index: {}]   ;;  %s1957_s3 = inlined_call_operand.vmem [shape: f32[128,128], index: 3, kind: input, shape index: {}]   ;;  %s1958_s4 = inlined_call_operand.vmem [shape: f32[8,128], index: 4, kind: input, shape index: {}]   ;;  %s1959_s5 = inlined_call_operand.vmem [shape: f32[3,128], index: 5, kind: input, shape index: {}]   ;;  %s1960_s6 = inlined_call_operand.vmem [shape: f32[8,1], index: 6, kind: input, shape index: {}]   ;;  %s1961_s7 = inlined_call_operand.hbm [shape: f32[8,256], index: 7, kind: output, shape index: {}]  }
   0x1   :  { %14 = vsyncpa [#allocation3 + $0x1], 0  ;;  %s1636_s24 = smov 0   ;;  %s1638_s25 = smov 0  }
   0x2   :  { %s1640_s26 = smov 0   ;;  %s1642_s27 = smov 0  }
   0x3 LB: > { %s1657_s28 = sadd.s32 4294967295, %s1589_s27   ;;  %s1077_s29 = sadd.s32 4294967294, %s1589_s27   ;;  %s1589_s27 = sphi %s1642_s27, %s1967_s27   ;;  %s1585_s26 = sphi %s1640_s26, %s1966_s26   ;;  %s1581_s25 = sphi %s1638_s25, %s1965_s25   ;;  %s1577_s24 = sphi %s1636_s24, %s1964_s24  }
   0x4   : > { %s1661_s30 = sadd.s32 1, %s1589_s27   ;;  %s179_s8 = sadd.s32 1, %s1585_s26 }
   0x5   : > { %s176_s9 = ssub.s32 %s1589_s27, %s1661_s30  ;;  %p189_p0 = scmp.ne.s32.totalorder %s1585_s26, %s1581_s25 }
   0x6   : > { %p177_p1 = scmp.eq.s32.totalorder %s176_s9, 0  ;;  %p190_p2 = scmp.eq.s32.totalorder %s1657_s28, 1 }
   0x7   : > { %p195_p3 = scmp.ne.s32.totalorder %s1581_s25, %s1577_s24  ;;  %p196_p4 = scmp.eq.s32.totalorder %s1077_s29, 1 }
   0x8   : > { %s1672_s10 = scalar_select %p177_p1, %s1585_s26, %s179_s8  }
   0x9   : > { %p1674_p5 = por %p190_p2, %p189_p0  ;;  %p1678_p6 = por %p196_p4, %p195_p3 }
   0xa   : > { %p1080_p7 = scmp.ge.s32.totalorder %s1589_s27, 1  ;;  %p241_p8 = scmp.lt.s32.totalorder %s1589_s27, 3 }
   0xc   : > { %p242_p9 = pnand %p1080_p7, %p241_p8 }
   0xd   : > { %v295_v0 = vld [vmem:[%s1955_s1] sm:$0xff] (!%p242_p9)  ;;  %v296_v1 = vld [vmem:[%s1955_s1 + $0x8] sm:$0xff] (!%p242_p9)  ;;  %v297_v2 = vld [vmem:[%s1955_s1 + $0x10] sm:$0xff] (!%p242_p9)  ;;  %s1082_s19 = sshll.u32 (!%p242_p9), %s1657_s28, 4  ;;  %vm304_vm0 = vcmask (!%p242_p9), 261120   ;;  %vm1592_vm1 = vmmov (!%p242_p9), 0  }
   0xe   : > { %245 = sbr.rel (%p242_p9) target bundleno = 978 (0x3d2), region = 48  ;;  %v1387_v3 = vpack.c.bf16 (!%p242_p9), %v296_v1, %v295_v0  ;;  %v298_v4 = vld [vmem:[%s1955_s1 + $0x18] sm:$0xff] (!%p242_p9)  ;;  %p274_p10 = scmp.lt.s32.totalorder (!%p242_p9), %s1082_s19, 31  ;;  %v530_v5 = vld [vmem:[%s1956_s2] sm:$0xff] (!%p242_p9)  ;;  %v531_v6 = vld [vmem:[%s1956_s2 + $0x8] sm:$0xff] (!%p242_p9) }
   0xf   : > { %v1391_v7 = vpack.c.bf16 (!%p242_p9), %v298_v4, %v297_v2  ;;  %v1395_v8 = vpack.c.bf16 (!%p242_p9), %v531_v6, %v530_v5  ;;  %v532_v9 = vld [vmem:[%s1956_s2 + $0x10] sm:$0xff] (!%p242_p9)  ;;  %v533_v10 = vld [vmem:[%s1956_s2 + $0x18] sm:$0xff] (!%p242_p9)  ;;  %v534_v12 = vld [vmem:[%s1956_s2 + $0x20] sm:$0xff] (!%p242_p9)  ;;  %s1104_s18 = sshll.u32 (!%p242_p9), %s1657_s28, 7  ;;  %s1595_s28 = smov (!%p242_p9), [#allocation2]  }
  0x10   : > { %1388 = vmatprep.subr.bf16.mxu0 (!%p242_p9), %v1387_v3  ;;  %v1399_v11 = vpack.c.bf16 (!%p242_p9), %v533_v10, %v532_v9  ;;  %v535_v13 = vld [vmem:[%s1956_s2 + $0x28] sm:$0xff] (!%p242_p9)  ;;  %v536_v16 = vld [vmem:[%s1956_s2 + $0x30] sm:$0xff] (!%p242_p9)  ;;  %v537_v17 = vld [vmem:[%s1956_s2 + $0x38] sm:$0xff] (!%p242_p9)  ;;  %s1912_s8 = scalar_lea.hbm (!%p242_p9), %s1961_s7, %s1104_s18  ;;  %s1531_s13 = sshll.u32 (!%p242_p9), %s1595_s28, 4  ;;  %s1532_s13 = int_to_ptr.vmem [resolvable:$false] %s1531_s13 }
  0x11   : > { %1390 = vmatpush3.bf16.msra.mxu0 (!%p242_p9), %v1387_v3  ;;  %1396 = vmatprep.subr.bf16.mxu1 (!%p242_p9), %v1395_v8  ;;  %v1403_v14 = vpack.c.bf16 (!%p242_p9), %v535_v13, %v534_v12  ;;  %v1407_v20 = vpack.c.bf16 (!%p242_p9), %v537_v17, %v536_v16  ;;  %v538_v21 = vld [vmem:[%s1956_s2 + $0x40] sm:$0xff] (!%p242_p9)  ;;  %v539_v22 = vld [vmem:[%s1956_s2 + $0x48] sm:$0xff] (!%p242_p9)  ;;  %v540_v26 = vld [vmem:[%s1956_s2 + $0x50] sm:$0xff] (!%p242_p9)  ;;  %s1533_s14 = scalar_lea.vmem (!%p242_p9), %s1532_s13, 256 }
  0x12   : > { %1392 = vmatprep.subr.bf16.mxu0 (!%p242_p9), %v1391_v7  ;;  %1398 = vmatpush3.bf16.msra.mxu1 (!%p242_p9), %v1395_v8  ;;  %v1411_v25 = vpack.c.bf16 (!%p242_p9), %v539_v22, %v538_v21  ;;  %v541_v27 = vld [vmem:[%s1956_s2 + $0x58] sm:$0xff] (!%p242_p9)  ;;  %v542_v40 = vld [vmem:[%s1956_s2 + $0x60] sm:$0xff] (!%p242_p9)  ;;  %v543_v41 = vld [vmem:[%s1956_s2 + $0x68] sm:$0xff] (!%p242_p9) }
  0x13   : > { %1400 = vmatprep.subr.bf16.mxu1 (!%p242_p9), %v1399_v11  ;;  %v1415_v30 = vpack.c.bf16 (!%p242_p9), %v541_v27, %v540_v26  ;;  %v1419_v42 = vpack.c.bf16 (!%p242_p9), %v543_v41, %v542_v40  ;;  %v544_v43 = vld [vmem:[%s1956_s2 + $0x70] sm:$0xff] (!%p242_p9)  ;;  %v545_v44 = vld [vmem:[%s1956_s2 + $0x78] sm:$0xff] (!%p242_p9)  ;;  %v728_v46 = vld [vmem:[%s1957_s3] sm:$0xff] (!%p242_p9) }
  0x14   : > { %v1423_v45 = vpack.c.bf16 (!%p242_p9), %v545_v44, %v544_v43  ;;  %v729_v47 = vld [vmem:[%s1957_s3 + $0x8] sm:$0xff] (!%p242_p9)  ;;  %v730_v48 = vld [vmem:[%s1957_s3 + $0x10] sm:$0xff] (!%p242_p9)  ;;  %v731_v50 = vld [vmem:[%s1957_s3 + $0x18] sm:$0xff] (!%p242_p9) }
  0x15   : > { %s1969_s19 = smov (!%p274_p10, %s1082_s19), 31  ;;  %1394 = vmatpush3.bf16.msra.mxu0 %v1391_v7  ;;  %v1427_v49 = vpack.c.bf16 %v729_v47, %v728_v46  ;;  %v1431_v51 = vpack.c.bf16 %v731_v50, %v730_v48  ;;  %v732_v52 = vld [vmem:[%s1957_s3 + $0x20] sm:$0xff]  ;;  %v733_v53 = vld [vmem:[%s1957_s3 + $0x28] sm:$0xff]  ;;  %v734_v55 = vld [vmem:[%s1957_s3 + $0x30] sm:$0xff] }
  0x16   : > { %s1083_s21 = sshll.u32 %s1969_s19, 3  ;;  %1402 = vmatpush3.bf16.msra.mxu1 %v1399_v11  ;;  %v1435_v54 = vpack.c.bf16 %v733_v53, %v732_v52  ;;  %v735_v56 = vld [vmem:[%s1957_s3 + $0x38] sm:$0xff]  ;;  %v736_v58 = vld [vmem:[%s1957_s3 + $0x40] sm:$0xff]  ;;  %v737_v59 = vld [vmem:[%s1957_s3 + $0x48] sm:$0xff] }
  0x17   : > { %s1718_s29 = scalar_lea.vmem %s1954_s0, %s1083_s21  ;;  %1404 = vmatprep.subr.bf16.mxu1 %v1403_v14  ;;  %1428 = vmatprep.subr.bf16.mxu0 %v1427_v49  ;;  %v1439_v57 = vpack.c.bf16 %v735_v56, %v734_v55  ;;  %v1443_v60 = vpack.c.bf16 %v737_v59, %v736_v58  ;;  %v738_v61 = vld [vmem:[%s1957_s3 + $0x50] sm:$0xff]  ;;  %v739_v62 = vld [vmem:[%s1957_s3 + $0x58] sm:$0xff]  ;;  %v1821_v0 = vld [vmem:[%s1959_s5] ss:$0 sm:$0xff] }
  0x18   : > { %v279_v15 = vld [vmem:[%s1718_s29] sm:$0xff]  ;;  %v280_v18 = vld [vmem:[%s1718_s29 + $0x8] sm:$0xff]  ;;  %v281_v19 = vld [vmem:[%s1718_s29 + $0x10] sm:$0xff]  ;;  %v1447_v63 = vpack.c.bf16 %v739_v62, %v738_v61 }
  0x19   : > { %1216 = vmatprep.mubr.msk.f32.mxu0 %vm304_vm0, %v279_v15  ;;  %v282_v23 = vld [vmem:[%s1718_s29 + $0x18] sm:$0xff]  ;;  %v283_v24 = vld [vmem:[%s1718_s29 + $0x20] sm:$0xff]  ;;  %v284_v28 = vld [vmem:[%s1718_s29 + $0x28] sm:$0xff] }
  0x1a   : > { %1217 = vmatmul.mubr.msk.f32.vlgmr.msra.gmra.mrb[0].mxu0 %vm304_vm0, %v280_v18  ;;  %1406 = vmatpush3.bf16.msra.mxu1 %v1403_v14  ;;  %v285_v29 = vld [vmem:[%s1718_s29 + $0x30] sm:$0xff]  ;;  %v286_v31 = vld [vmem:[%s1718_s29 + $0x38] sm:$0xff]  ;;  %v287_v32 = vld [vmem:[%s1718_s29 + $0x40] sm:$0xff] }
  0x1b   : > { %1219 = vmatprep.mubr.msk.f32.mxu0 %vm304_vm0, %v281_v19  ;;  %1408 = vmatprep.subr.bf16.mxu1 %v1407_v20  ;;  %v288_v33 = vld [vmem:[%s1718_s29 + $0x48] sm:$0xff]  ;;  %v289_v34 = vld [vmem:[%s1718_s29 + $0x50] sm:$0xff]  ;;  %v290_v35 = vld [vmem:[%s1718_s29 + $0x58] sm:$0xff] }
  0x1c   : > { %v291_v36 = vld [vmem:[%s1718_s29 + $0x60] sm:$0xff]  ;;  %v292_v37 = vld [vmem:[%s1718_s29 + $0x68] sm:$0xff]  ;;  %v293_v38 = vld [vmem:[%s1718_s29 + $0x70] sm:$0xff]  ;;  %1430 = vmatpush3.bf16.msra.mxu0 %v1427_v49 }
  0x1d   : > { %v294_v39 = vld [vmem:[%s1718_s29 + $0x78] sm:$0xff]  ;;  %1432 = vmatprep.subr.bf16.mxu0 %v1431_v51  ;;  %s270_s29 = sand.u32 1, %s1581_s25  }
  0x1e   : > { %1220 = vmatmul.mubr.msk.f32.gmra.mrb[2].mxu0 %vm304_vm0, %v282_v23  ;;  %1410 = vmatpush3.bf16.msra.mxu1 %v1407_v20  ;;  %s1081_s17 = sshll.u32 %s270_s29, 3  ;;  %s1005_s9 = scalar_lea.sflag [#allocation3], %s270_s29 }
  0x1f   : > { %1222 = vmatprep.mubr.msk.f32.mxu0 %vm304_vm0, %v283_v24  ;;  %1412 = vmatprep.subr.bf16.mxu1 %v1411_v25  ;;  %s272_s20 = scalar_lea.vmem [#allocation2], %s1081_s17 }
  0x20   : > { %1434 = vmatpush3.bf16.msra.mxu0 %v1431_v51  ;;  %s1018_s21 = sshll.u32 %s272_s20, 4  ;;  %s1914_s21 = int_to_ptr.vmem [resolvable:$true] %s1018_s21 }
  0x21   : > { %1436 = vmatprep.subr.bf16.mxu0 %v1435_v54  ;;  %s1527_s19 = scalar_lea.vmem %s1914_s21, 128  ;;  %p1534_p0 = scmp.lt.s32.totalorder %s1914_s21, %s1532_s13 }
  0x22   : > { %1223 = vmatmul.mubr.msk.f32.gmra.mrb[4].mxu0 %vm304_vm0, %v284_v28  ;;  %1414 = vmatpush3.bf16.msra.mxu1 %v1411_v25  ;;  %p1528_p11 = scmp.ne.s32.totalorder %s1914_s21, %s1527_s19  ;;  %p1535_p1 = scmp.lt.s32.totalorder %s1533_s14, %s1527_s19 }
  0x23   : > { %1225 = vmatprep.mubr.msk.f32.mxu0 %vm304_vm0, %v285_v29  ;;  %1416 = vmatprep.subr.bf16.mxu1 %v1415_v30 }
  0x24   : > { %1438 = vmatpush3.bf16.msra.mxu0 %v1435_v54  ;;  %p1529_p12 = pnand %p1528_p11, %p1674_p5  ;;  %p1536_p2 = por %p1535_p1, %p1534_p0 }
  0x25   : > { %1440 = vmatprep.subr.bf16.mxu0 %v1439_v57 }
  0x26   : > { %1226 = vmatmul.mubr.msk.f32.gmra.mrb[6].mxu0 %vm304_vm0, %v286_v31  ;;  %1418 = vmatpush3.bf16.msra.mxu1 %v1415_v30  ;;  %p1530_p13 = pneg %p1529_p12 }
  0x27   : > { %1228 = vmatprep.mubr.msk.f32.mxu0 %vm304_vm0, %v287_v32  ;;  %1420 = vmatprep.subr.bf16.mxu1 %v1419_v42 }
  0x28   : > { %1442 = vmatpush3.bf16.msra.mxu0 %v1439_v57  ;;  %p1537_p3 = pnand %p1536_p2, %p1530_p13 }
  0x29   : > { %1444 = vmatprep.subr.bf16.mxu0 %v1443_v60 }
  0x2a   : > { %1229 = vmatmul.mubr.msk.f32.gmra.mrb[8].mxu0 %vm304_vm0, %v288_v33  ;;  %1422 = vmatpush3.bf16.msra.mxu1 %v1419_v42 }
  0x2b   : > { %1231 = vmatprep.mubr.msk.f32.mxu0 %vm304_vm0, %v289_v34  ;;  %1424 = vmatprep.subr.bf16.mxu1 %v1423_v45 }
  0x2c   : > { %1446 = vmatpush3.bf16.msra.mxu0 %v1443_v60 }
  0x2d   : > { %1448 = vmatprep.subr.bf16.mxu0 %v1447_v63 }
  0x2e   : > { %1232 = vmatmul.mubr.msk.f32.gmra.mrb[10].mxu0 %vm304_vm0, %v290_v35  ;;  %1426 = vmatpush3.bf16.msra.mxu1 %v1423_v45 }
  0x2f   : > { %1234 = vmatprep.mubr.msk.f32.mxu0 %vm304_vm0, %v291_v36 }
  0x30   : > { %1450 = vmatpush3.bf16.msra.mxu0 %v1447_v63 }
  0x32   : > { %1235 = vmatmul.mubr.msk.f32.gmra.mrb[12].mxu0 %vm304_vm0, %v292_v37 }
  0x33   : > { %1237 = vmatprep.mubr.msk.f32.mxu0 %vm304_vm0, %v293_v38 }
  0x36   : > { %1238 = vmatmul.mubr.msk.f32.gmra.mrb[14].mxu0 %vm304_vm0, %v294_v39 }
  0xed   : > { %v1218_v1 = vpop.f32.mrb[0].mxu0 }
  0xee   : > { %v425_v2 = vadd.f32 %v1218_v1, %v1821_v0  ;;  %v419_v3 = vpop.f32.mrb[1].mxu0 }
  0xef   : > { %v420_v4 = vadd.f32 %v1821_v0, %v419_v3  ;;  %v741_v3 = vld [vmem:[%s1957_s3 + $0x68] sm:$0xff] }
  0xf0   : > { %v499_v5 = vmul.f32 0.2, %v425_v2 }
  0xf1   : > { %v1221_v6 = vpop.f32.mrb[2].mxu0  ;;  %v498_v7 = vmul.f32 0.2, %v420_v4 }
  0xf2   : > { %v435_v8 = vadd.f32 %v1221_v6, %v1821_v0  ;;  %v429_v9 = vpop.f32.mrb[3].mxu0  ;;  %v515_v12 = vmax.f32 %v425_v2, %v499_v5  ;;  %v740_v2 = vld [vmem:[%s1957_s3 + $0x60] sm:$0xff]  ;;  %v743_v5 = vld [vmem:[%s1957_s3 + $0x78] sm:$0xff] }
  0xf3   : > { %v430_v10 = vadd.f32 %v1821_v0, %v429_v9  ;;  %v514_v11 = vmax.f32 %v420_v4, %v498_v7  ;;  %v1451_v4 = vpack.c.bf16 %v741_v3, %v740_v2  ;;  %v1854_v7 = vld [vmem:[%s1959_s5 + $0x1] ss:$0 sm:$0xff] }
  0xf4   : > { %v501_v13 = vmul.f32 0.2, %v435_v8 }
  0xf5   : > { %v500_v14 = vmul.f32 0.2, %v430_v10  ;;  %v1224_v15 = vpop.f32.mrb[4].mxu0  ;;  %1272 = vmatprep.mubr.f32.mxu1 %v514_v11  ;;  %1452 = vmatprep.subr.bf16.mxu0 %v1451_v4 }
  0xf6   : > { %v517_v16 = vmax.f32 %v435_v8, %v501_v13  ;;  %v445_v17 = vadd.f32 %v1224_v15, %v1821_v0  ;;  %v439_v18 = vpop.f32.mrb[5].mxu0  ;;  %1273 = vmatmul.mubr.f32.vlgmr.msra.gmra.mrb[0].mxu1 %v515_v12  ;;  %1454 = vmatpush3.bf16.msra.mxu0 %v1451_v4 }
  0xf7   : > { %v516_v19 = vmax.f32 %v430_v10, %v500_v14  ;;  %v440_v20 = vadd.f32 %v1821_v0, %v439_v18 }
  0xf8   : > { %v503_v21 = vmul.f32 0.2, %v445_v17 }
  0xf9   : > { %v502_v22 = vmul.f32 0.2, %v440_v20  ;;  %1275 = vmatprep.mubr.f32.mxu1 %v516_v19  ;;  %v1227_v23 = vpop.f32.mrb[6].mxu0 }
  0xfa   : > { %v519_v24 = vmax.f32 %v445_v17, %v503_v21  ;;  %v455_v25 = vadd.f32 %v1227_v23, %v1821_v0  ;;  %1276 = vmatmul.mubr.f32.gmra.mrb[2].mxu1 %v517_v16  ;;  %v449_v26 = vpop.f32.mrb[7].mxu0 }
  0xfb   : > { %v518_v27 = vmax.f32 %v440_v20, %v502_v22  ;;  %v450_v28 = vadd.f32 %v1821_v0, %v449_v26 }
  0xfc   : > { %v505_v29 = vmul.f32 0.2, %v455_v25 }
  0xfd   : > { %v504_v30 = vmul.f32 0.2, %v450_v28  ;;  %1278 = vmatprep.mubr.f32.mxu1 %v518_v27  ;;  %v1230_v31 = vpop.f32.mrb[8].mxu0 }
  0xfe   : > { %v521_v32 = vmax.f32 %v455_v25, %v505_v29  ;;  %1279 = vmatmul.mubr.f32.gmra.mrb[4].mxu1 %v519_v24  ;;  %v465_v33 = vadd.f32 %v1230_v31, %v1821_v0  ;;  %v459_v34 = vpop.f32.mrb[9].mxu0 }
  0xff   : > { %v520_v35 = vmax.f32 %v450_v28, %v504_v30  ;;  %v460_v36 = vadd.f32 %v1821_v0, %v459_v34 }
 0x100   : > { %v507_v37 = vmul.f32 0.2, %v465_v33 }
 0x101   : > { %1281 = vmatprep.mubr.f32.mxu1 %v520_v35  ;;  %v506_v38 = vmul.f32 0.2, %v460_v36  ;;  %v1233_v39 = vpop.f32.mrb[10].mxu0 }
 0x102   : > { %v523_v40 = vmax.f32 %v465_v33, %v507_v37  ;;  %1282 = vmatmul.mubr.f32.gmra.mrb[6].mxu1 %v521_v32  ;;  %v475_v41 = vadd.f32 %v1233_v39, %v1821_v0  ;;  %v469_v42 = vpop.f32.mrb[11].mxu0 }
 0x103   : > { %v522_v43 = vmax.f32 %v460_v36, %v506_v38  ;;  %v470_v44 = vadd.f32 %v1821_v0, %v469_v42 }
 0x104   : > { %v509_v45 = vmul.f32 0.2, %v475_v41 }
 0x105   : > { %1284 = vmatprep.mubr.f32.mxu1 %v522_v43  ;;  %v508_v46 = vmul.f32 0.2, %v470_v44  ;;  %v1236_v47 = vpop.f32.mrb[12].mxu0 }
 0x106   : > { %v525_v48 = vmax.f32 %v475_v41, %v509_v45  ;;  %1285 = vmatmul.mubr.f32.gmra.mrb[8].mxu1 %v523_v40  ;;  %v485_v49 = vadd.f32 %v1236_v47, %v1821_v0  ;;  %v479_v50 = vpop.f32.mrb[13].mxu0 }
 0x107   : > { %v524_v51 = vmax.f32 %v470_v44, %v508_v46  ;;  %v480_v52 = vadd.f32 %v1821_v0, %v479_v50 }
 0x108   : > { %v511_v53 = vmul.f32 0.2, %v485_v49 }
 0x109   : > { %1287 = vmatprep.mubr.f32.mxu1 %v524_v51  ;;  %v510_v54 = vmul.f32 0.2, %v480_v52  ;;  %v1239_v55 = vpop.f32.mrb[14].mxu0 }
 0x10a   : > { %v527_v56 = vmax.f32 %v485_v49, %v511_v53  ;;  %1288 = vmatmul.mubr.f32.gmra.mrb[10].mxu1 %v525_v48  ;;  %v495_v57 = vadd.f32 %v1239_v55, %v1821_v0  ;;  %v489_v58 = vpop.f32.mrb[15].mxu0 }
 0x10b   : > { %v526_v59 = vmax.f32 %v480_v52, %v510_v54  ;;  %v490_v60 = vadd.f32 %v1821_v0, %v489_v58  ;;  %v742_v0 = vld [vmem:[%s1957_s3 + $0x70] sm:$0xff] }
 0x10c   : > { %v513_v61 = vmul.f32 0.2, %v495_v57  ;;  %v1455_v6 = vpack.c.bf16 %v743_v5, %v742_v0 }
 0x10d   : > { %1290 = vmatprep.mubr.f32.mxu1 %v526_v59  ;;  %v512_v62 = vmul.f32 0.2, %v490_v60 }
 0x10e   : > { %v529_v63 = vmax.f32 %v495_v57, %v513_v61  ;;  %1291 = vmatmul.mubr.f32.gmra.mrb[12].mxu1 %v527_v56  ;;  %1456 = vmatprep.subr.bf16.mxu0 %v1455_v6 }
 0x10f   : > { %v528_v1 = vmax.f32 %v490_v60, %v512_v62  ;;  %1458 = vmatpush3.bf16.msra.mxu0 %v1455_v6 }
 0x111   : > { %1293 = vmatprep.mubr.f32.mxu1 %v528_v1 }
 0x112   : > { %1294 = vmatmul.mubr.f32.gmra.mrb[14].mxu1 %v529_v63 }
 0x1c9   : > { %v1274_v8 = vpop.f32.mrb[0].mxu1 }
 0x1ca   : > { %v623_v9 = vadd.f32 %v1274_v8, %v1854_v7  ;;  %v617_v10 = vpop.f32.mrb[1].mxu1 }
 0x1cb   : > { %v618_v11 = vadd.f32 %v1854_v7, %v617_v10  ;;  %v1593_v10 = vmov 0.0  }
 0x1cc   : > { %v697_v12 = vmul.f32 0.2, %v623_v9  ;;  %1384 = vmatprep.mubr.msk.f32.mxu1 %vm1592_vm1, %v1593_v10 }
 0x1cd   : > { %v696_v13 = vmul.f32 0.2, %v618_v11  ;;  %v1277_v14 = vpop.f32.mrb[2].mxu1 }
 0x1ce   : > { %v633_v15 = vadd.f32 %v1277_v14, %v1854_v7  ;;  %v627_v16 = vpop.f32.mrb[3].mxu1  ;;  %v713_v19 = vmax.f32 %v623_v9, %v697_v12  ;;  %v1591_v9 = vmov 0.0|0.0   ;;  %v1594_v12 = vmov 0  }
 0x1cf   : > { %v712_v17 = vmax.f32 %v618_v11, %v696_v13  ;;  %v628_v18 = vadd.f32 %v1854_v7, %v627_v16  ;;  %1459 = vmatprep.subr.bf16.mxu1 %v1591_v9  ;;  %v927_v11 = vld [vmem:[%s1960_s6] sm:$0xff]  ;;  %1526 = vset.pattern.permute.xlu0 %v1594_v12 }
 0x1d0   : > { %v699_v20 = vmul.f32 0.2, %v633_v15  ;;  %930 = vperm.xlu0 %1526, %v927_v11  }
 0x1d1   : > { %v698_v21 = vmul.f32 0.2, %v628_v18  ;;  %v1280_v22 = vpop.f32.mrb[4].mxu1  ;;  %1328 = vmatprep.mubr.f32.mxu0 %v712_v17 }
 0x1d2   : > { %v643_v23 = vadd.f32 %v1280_v22, %v1854_v7  ;;  %v637_v24 = vpop.f32.mrb[5].mxu1  ;;  %1329 = vmatmul.mubr.f32.vlgmr.msra.gmra.mrb[16].mxu0 %v713_v19  ;;  %v715_v27 = vmax.f32 %v633_v15, %v699_v20 }
 0x1d3   : > { %v714_v25 = vmax.f32 %v628_v18, %v698_v21  ;;  %v638_v26 = vadd.f32 %v1854_v7, %v637_v24 }
 0x1d4   : > { %v701_v28 = vmul.f32 0.2, %v643_v23 }
 0x1d5   : > { %v700_v29 = vmul.f32 0.2, %v638_v26  ;;  %1331 = vmatprep.mubr.f32.mxu0 %v714_v25  ;;  %v1283_v30 = vpop.f32.mrb[6].mxu1 }
 0x1d6   : > { %v717_v31 = vmax.f32 %v643_v23, %v701_v28  ;;  %v653_v32 = vadd.f32 %v1283_v30, %v1854_v7  ;;  %1332 = vmatmul.mubr.f32.gmra.mrb[18].mxu0 %v715_v27  ;;  %v647_v33 = vpop.f32.mrb[7].mxu1 }
 0x1d7   : > { %v716_v34 = vmax.f32 %v638_v26, %v700_v29  ;;  %v648_v35 = vadd.f32 %v1854_v7, %v647_v33 }
 0x1d8   : > { %v703_v36 = vmul.f32 0.2, %v653_v32 }
 0x1d9   : > { %v702_v37 = vmul.f32 0.2, %v648_v35  ;;  %1334 = vmatprep.mubr.f32.mxu0 %v716_v34  ;;  %v1286_v38 = vpop.f32.mrb[8].mxu1 }
 0x1da   : > { %v719_v39 = vmax.f32 %v653_v32, %v703_v36  ;;  %1335 = vmatmul.mubr.f32.gmra.mrb[20].mxu0 %v717_v31  ;;  %v663_v40 = vadd.f32 %v1286_v38, %v1854_v7  ;;  %v657_v41 = vpop.f32.mrb[9].mxu1 }
 0x1db   : > { %v718_v42 = vmax.f32 %v648_v35, %v702_v37  ;;  %v658_v43 = vadd.f32 %v1854_v7, %v657_v41 }
 0x1dc   : > { %v705_v44 = vmul.f32 0.2, %v663_v40 }
 0x1dd   : > { %1337 = vmatprep.mubr.f32.mxu0 %v718_v42  ;;  %v704_v45 = vmul.f32 0.2, %v658_v43  ;;  %v1289_v46 = vpop.f32.mrb[10].mxu1 }
 0x1de   : > { %v721_v47 = vmax.f32 %v663_v40, %v705_v44  ;;  %1338 = vmatmul.mubr.f32.gmra.mrb[22].mxu0 %v719_v39  ;;  %v673_v48 = vadd.f32 %v1289_v46, %v1854_v7  ;;  %v667_v49 = vpop.f32.mrb[11].mxu1 }
 0x1df   : > { %v720_v50 = vmax.f32 %v658_v43, %v704_v45  ;;  %v668_v51 = vadd.f32 %v1854_v7, %v667_v49 }
 0x1e0   : > { %v707_v52 = vmul.f32 0.2, %v673_v48 }
 0x1e1   : > { %1340 = vmatprep.mubr.f32.mxu0 %v720_v50  ;;  %v706_v53 = vmul.f32 0.2, %v668_v51  ;;  %v1292_v54 = vpop.f32.mrb[12].mxu1 }
 0x1e2   : > { %v723_v55 = vmax.f32 %v673_v48, %v707_v52  ;;  %1341 = vmatmul.mubr.f32.gmra.mrb[24].mxu0 %v721_v47  ;;  %v683_v56 = vadd.f32 %v1292_v54, %v1854_v7  ;;  %v677_v57 = vpop.f32.mrb[13].mxu1 }
 0x1e3   : > { %v722_v58 = vmax.f32 %v668_v51, %v706_v53  ;;  %v678_v59 = vadd.f32 %v1854_v7, %v677_v57 }
 0x1e4   : > { %v709_v60 = vmul.f32 0.2, %v683_v56 }
 0x1e5   : > { %1343 = vmatprep.mubr.f32.mxu0 %v722_v58  ;;  %v708_v61 = vmul.f32 0.2, %v678_v59  ;;  %v1295_v62 = vpop.f32.mrb[14].mxu1 }
 0x1e6   : > { %v725_v63 = vmax.f32 %v683_v56, %v709_v60  ;;  %1344 = vmatmul.mubr.f32.gmra.mrb[26].mxu0 %v723_v55  ;;  %v693_v1 = vadd.f32 %v1295_v62, %v1854_v7  ;;  %v687_v2 = vpop.f32.mrb[15].mxu1 }
 0x1e7   : > { %v724_v3 = vmax.f32 %v678_v59, %v708_v61  ;;  %v688_v4 = vadd.f32 %v1854_v7, %v687_v2  ;;  %v1879_v7 = vld [vmem:[%s1959_s5 + $0x2] ss:$0 sm:$0xff] }
 0x1e8   : > { %v711_v0 = vmul.f32 0.2, %v693_v1 }
 0x1e9   : > { %1346 = vmatprep.mubr.f32.mxu0 %v724_v3  ;;  %v710_v5 = vmul.f32 0.2, %v688_v4 }
 0x1ea   : > { %v727_v6 = vmax.f32 %v693_v1, %v711_v0  ;;  %1347 = vmatmul.mubr.f32.gmra.mrb[28].mxu0 %v725_v63 }
 0x1eb   : > { %v726_v8 = vmax.f32 %v688_v4, %v710_v5 }
 0x1ed   : > { %1349 = vmatprep.mubr.f32.mxu0 %v726_v8 }
 0x1ee   : > { %1350 = vmatmul.mubr.f32.gmra.mrb[30].mxu0 %v727_v6 }
 0x2a5   : > { %v1330_v13 = vpop.f32.mrb[16].mxu0 }
 0x2a6   : > { %v821_v14 = vadd.f32 %v1330_v13, %v1879_v7  ;;  %v815_v15 = vpop.f32.mrb[17].mxu0 }
 0x2a7   : > { %v816_v16 = vadd.f32 %v1879_v7, %v815_v15 }
 0x2a8   : > { %v895_v17 = vmul.f32 0.2, %v821_v14 }
 0x2a9   : > { %v894_v18 = vmul.f32 0.2, %v816_v16  ;;  %v1333_v19 = vpop.f32.mrb[18].mxu0 }
 0x2aa   : > { %v911_v20 = vmax.f32 %v821_v14, %v895_v17  ;;  %v831_v21 = vadd.f32 %v1333_v19, %v1879_v7  ;;  %v825_v22 = vpop.f32.mrb[19].mxu0 }
 0x2ab   : > { %v910_v23 = vmax.f32 %v816_v16, %v894_v18  ;;  %v826_v24 = vadd.f32 %v1879_v7, %v825_v22 }
 0x2ac   : > { %v897_v25 = vmul.f32 0.2, %v831_v21 }
 0x2ad   : > { %v1460_v26 = vpack.c.bf16 %v911_v20, %v910_v23  ;;  %v896_v27 = vmul.f32 0.2, %v826_v24  ;;  %v1336_v28 = vpop.f32.mrb[20].mxu0  ;;  %v931_v23 = vpop.permute.xlu0 %930 }
 0x2ae   : > { %v913_v29 = vmax.f32 %v831_v21, %v897_v25  ;;  %v841_v30 = vadd.f32 %v1336_v28, %v1879_v7  ;;  %v835_v31 = vpop.f32.mrb[21].mxu0 }
 0x2af   : > { %v912_v32 = vmax.f32 %v826_v24, %v896_v27  ;;  %v836_v33 = vadd.f32 %v1879_v7, %v835_v31  ;;  %1461 = vmatpush3.bf16.xpose.msra.mxu1 %v1460_v26 }
 0x2b0   : > { %v899_v34 = vmul.f32 0.2, %v841_v30  ;;  %1462 = vmatprep.subr.bf16.mxu1 %v1591_v9 }
 0x2b1   : > { %v1463_v35 = vpack.c.bf16 %v913_v29, %v912_v32  ;;  %v898_v36 = vmul.f32 0.2, %v836_v33  ;;  %v1339_v37 = vpop.f32.mrb[22].mxu0 }
 0x2b2   : > { %v915_v38 = vmax.f32 %v841_v30, %v899_v34  ;;  %v851_v39 = vadd.f32 %v1339_v37, %v1879_v7  ;;  %v845_v40 = vpop.f32.mrb[23].mxu0 }
 0x2b3   : > { %v914_v41 = vmax.f32 %v836_v33, %v898_v36  ;;  %v846_v42 = vadd.f32 %v1879_v7, %v845_v40 }
 0x2b4   : > { %v901_v43 = vmul.f32 0.2, %v851_v39 }
 0x2b5   : > { %v1466_v44 = vpack.c.bf16 %v915_v38, %v914_v41  ;;  %v900_v45 = vmul.f32 0.2, %v846_v42  ;;  %v1342_v46 = vpop.f32.mrb[24].mxu0 }
 0x2b6   : > { %v917_v47 = vmax.f32 %v851_v39, %v901_v43  ;;  %v861_v48 = vadd.f32 %v1342_v46, %v1879_v7  ;;  %v855_v49 = vpop.f32.mrb[25].mxu0 }
 0x2b7   : > { %v916_v50 = vmax.f32 %v846_v42, %v900_v45  ;;  %1464 = vmatpush3.bf16.xpose.msra.mxu1 %v1463_v35  ;;  %v856_v51 = vadd.f32 %v1879_v7, %v855_v49 }
 0x2b8   : > { %v903_v52 = vmul.f32 0.2, %v861_v48  ;;  %1465 = vmatprep.subr.bf16.mxu1 %v1591_v9 }
 0x2b9   : > { %v1469_v53 = vpack.c.bf16 %v917_v47, %v916_v50  ;;  %v902_v54 = vmul.f32 0.2, %v856_v51  ;;  %v1345_v55 = vpop.f32.mrb[26].mxu0 }
 0x2ba   : > { %v919_v56 = vmax.f32 %v861_v48, %v903_v52  ;;  %v871_v57 = vadd.f32 %v1345_v55, %v1879_v7  ;;  %v865_v58 = vpop.f32.mrb[27].mxu0 }
 0x2bb   : > { %v918_v59 = vmax.f32 %v856_v51, %v902_v54  ;;  %v866_v60 = vadd.f32 %v1879_v7, %v865_v58 }
 0x2bc   : > { %v905_v61 = vmul.f32 0.2, %v871_v57 }
 0x2bd   : > { %v1472_v62 = vpack.c.bf16 %v919_v56, %v918_v59  ;;  %v904_v63 = vmul.f32 0.2, %v866_v60  ;;  %v1348_v1 = vpop.f32.mrb[28].mxu0 }
 0x2be   : > { %v921_v2 = vmax.f32 %v871_v57, %v905_v61  ;;  %v881_v3 = vadd.f32 %v1348_v1, %v1879_v7  ;;  %v875_v4 = vpop.f32.mrb[29].mxu0 }
 0x2bf   : > { %1467 = vmatpush3.bf16.xpose.msra.mxu1 %v1466_v44  ;;  %v920_v0 = vmax.f32 %v866_v60, %v904_v63  ;;  %v876_v5 = vadd.f32 %v1879_v7, %v875_v4 }
 0x2c0   : > { %1468 = vmatprep.subr.bf16.mxu1 %v1591_v9  ;;  %v907_v6 = vmul.f32 0.2, %v881_v3 }
 0x2c1   : > { %v1475_v8 = vpack.c.bf16 %v921_v2, %v920_v0  ;;  %v906_v10 = vmul.f32 0.2, %v876_v5  ;;  %v1351_v11 = vpop.f32.mrb[30].mxu0 }
 0x2c2   : > { %v923_v12 = vmax.f32 %v881_v3, %v907_v6  ;;  %v891_v13 = vadd.f32 %v1351_v11, %v1879_v7  ;;  %v885_v14 = vpop.f32.mrb[31].mxu0 }
 0x2c3   : > { %v922_v15 = vmax.f32 %v876_v5, %v906_v10  ;;  %v886_v16 = vadd.f32 %v1879_v7, %v885_v14  ;;  %v926_v7 = vld [vmem:[%s1958_s4] sm:$0xff] }
 0x2c4   : > { %v909_v17 = vmul.f32 0.2, %v891_v13 }
 0x2c5   : > { %v1478_v18 = vpack.c.bf16 %v923_v12, %v922_v15  ;;  %v908_v19 = vmul.f32 0.2, %v886_v16 }
 0x2c6   : > { %v925_v20 = vmax.f32 %v891_v13, %v909_v17 }
 0x2c7   : > { %1470 = vmatpush3.bf16.xpose.msra.mxu1 %v1469_v53  ;;  %v924_v21 = vmax.f32 %v886_v16, %v908_v19 }
 0x2c8   : > { %1471 = vmatprep.subr.bf16.mxu1 %v1591_v9 }
 0x2c9   : > { %v1481_v22 = vpack.c.bf16 %v925_v20, %v924_v21 }
 0x2cf   : > { %1473 = vmatpush3.bf16.xpose.msra.mxu1 %v1472_v62 }
 0x2d0   : > { %1474 = vmatprep.subr.bf16.mxu1 %v1591_v9 }
 0x2d7   : > { %1476 = vmatpush3.bf16.xpose.msra.mxu1 %v1475_v8 }
 0x2d8   : > { %1477 = vmatprep.subr.bf16.mxu1 %v1591_v9 }
 0x2df   : > { %1479 = vmatpush3.bf16.xpose.msra.mxu1 %v1478_v18 }
 0x2e0   : > { %1480 = vmatprep.subr.bf16.mxu1 %v1591_v9 }
 0x2e7   : > { %1482 = vmatpush3.bf16.xpose.msra.mxu1 %v1481_v22 }
 0x2ee   : > { %1385 = vmatmul.mubr.f32.vlgmr.msra.gmra.mrb[16].mxu1 %v926_v7 }
 0x3c1   : > { %v999_v24 = vpop.f32.mrb[16].mxu1 }
 0x3c2   : > { %v1000_v25 = vadd.f32 %v999_v24, %v931_v23  ;;  %v1386_v26 = vpop.f32.mrb[17].mxu1 }
 0x3c4   : > { %1003 = vst [vmem:[%s272_s20] sm:$0xff] %v1000_v25 }
 0x3c5   : > { %1540 = shalt.err (!%p1537_p3)
}
 0x3c6   : > { %s1541_s15 = scalar_lea.hbm %s1912_s8, 128  ;;  %s1545_s17 = scalar_lea.hbm %s1961_s7, 256 }
 0x3c7   : > { %p1542_p4 = scmp.ne.s32.totalorder %s1912_s8, %s1541_s15  ;;  %p1546_p9 = scmp.lt.u32.totalorder %s1912_s8, %s1961_s7 }
 0x3c8   : > { %p1547_p10 = scmp.lt.u32.totalorder %s1545_s17, %s1541_s15  ;;  %p1549_p12 = scmp.lt.u32.totalorder %s1541_s15, %s1912_s8 }
 0x3c9   : > { %p1543_p7 = pnand %p1542_p4, %p1674_p5 }
 0x3ca   : > { %p1548_p11 = por %p1547_p10, %p1546_p9 }
 0x3cb   : > { %p1544_p8 = pneg %p1543_p7 }
 0x3cc   : > { %p1550_p13 = por %p1549_p12, %p1548_p11 }
 0x3ce   : > { %p1551_p0 = pnand %p1550_p13, %p1544_p8 }
 0x3d0   : > { %1554 = shalt.err (!%p1551_p0)
}
 0x3d1   : > { %1483 = dma.vmem_to_hbm [thread:$0]  (%p1674_p5), %s1914_s21, 128, %s1912_s8, %s1005_s9  }
 0x3d2 PF: > { %p1489_p1 = scmp.ge.s32.totalorder %s1589_s27, 2  ;;  %s1030_s22 = sand.u32 1, %s1577_s24  }
 0x3d3   : > { %s1031_s23 = scalar_lea.sflag [#allocation3], %s1030_s22 }
 0x3d4   : > { %p1486_p2 = pnand %p1489_p1, %p1678_p6 }
 0x3d6   : > { %1572 = dma.done.wait (!%p1486_p2), %s1031_s23, 128  }
 0x3d7   : > { %1574 = vsyncadd (!%p1486_p2), %s1031_s23, 4294967168  ;;  %p17_p3 = scmp.ge.s32.totalorder %s1661_s30, 4   ;;  %s1964_s24 = smov %s1581_s25 }
 0x3d8   : > { %s1965_s25 = smov %s1585_s26  ;;  %s1966_s26 = smov %s1672_s10 }
 0x3d9   : > { %s1967_s27 = smov %s1661_s30  ;;  %19 = sbr.rel (!%p17_p3) target bundleno = 3 (0x3), region = 83 }
 0x3e0   :  { %1036 = vsyncpa [#allocation3], 1 }
 0x3e1   :  { %1038 = vsyncpa [#allocation3 + $0x1], 1 }

</bundles_post_ra>
